<compile_context>
chip_gen: v7x
topology: tpu7x:2x2x1
jax: 0.10.0
libtpu: 0.0.40
codegen_flags: <defaults>
</compile_context>

<pallas_src>
import jax
import jax.numpy as jnp
from jax.experimental import pallas as pl
from jax.experimental.pallas import tpu as pltpu

HIDDEN = 256
OUT_DIM = 128
EPS = 1e-12  # matches torch.nn.functional.normalize default eps


def _round_up(v, m):
    return (v + m - 1) // m * m


def projection_head_kernel(x_ref, w1_ref, b1_ref, w2_ref, b2_ref, o_ref):
    # Hoisted bias reads ((1, N) rows -> sublane broadcast on the add).
    b1 = b1_ref[...]
    b2 = b2_ref[...]

    # Linear 1 + ReLU (MXU matmul, f32 accumulation).
    h = jnp.dot(x_ref[...], w1_ref[...], preferred_element_type=jnp.float32)
    h = jnp.maximum(h + b1, 0.0)

    # Linear 2 + ReLU.
    y = jnp.dot(h, w2_ref[...], preferred_element_type=jnp.float32)
    y = jnp.maximum(y + b2, 0.0)

    # L2 normalize along the last dim:
    #   y / max(||y||_2, eps) == y * rsqrt(max(sum(y^2), eps^2))   (sqrt is monotone)
    # rsqrt lands on the otherwise-idle EUP slot; the cross-lane sum uses the XLU.
    ssum = jnp.sum(y * y, axis=-1, keepdims=True)
    o_ref[...] = (y * jax.lax.rsqrt(jnp.maximum(ssum, EPS * EPS))).astype(o_ref.dtype)


def projection_head(x, w1, b1, w2, b2, *, block_b=512):
    """x: [B, D] f32; w1: [D, 256]; b1: [256]; w2: [256, 128]; b2: [128].
    Returns [B, 128] f32 with L2-normalized rows."""
    B, D = x.shape
    assert w1.shape == (D, HIDDEN) and b1.shape == (HIDDEN,)
    assert w2.shape == (HIDDEN, OUT_DIM) and b2.shape == (OUT_DIM,)

    # Pad the contraction dim to a multiple of 128 so each MXU pass is fully fed (exact).
    D_pad = _round_up(D, 128)
    if D_pad != D:
        x = jnp.pad(x, ((0, 0), (0, D_pad - D)))
        w1 = jnp.pad(w1, ((0, D_pad - D), (0, 0)))

    b1_2d = b1.reshape(1, HIDDEN)
    b2_2d = b2.reshape(1, OUT_DIM)

    # Batch tile: big enough to fill the MXU M-dim and amortize per-grid-step overhead,
    # but keep >= 2 grid steps when B allows (megacore sharding of the "parallel" axis).
    # Edge tiles are handled by Pallas masking — no divisibility requirement on B.
    if B >= 16:
        block_b_eff = min(block_b, _round_up(pl.cdiv(B, 2), 8))
    else:
        block_b_eff = min(block_b, _round_up(B, 8))
    grid = (pl.cdiv(B, block_b_eff),)

    # Weights/biases never change across grid steps -> single buffer saves VMEM.
    resident = pl.Buffered(1)

    param_bytes = (D_pad * HIDDEN + HIDDEN * OUT_DIM + HIDDEN + OUT_DIM) * 4
    io_bytes = 2 * block_b_eff * (D_pad + OUT_DIM) * 4  # double-buffered x + out tiles
    vmem_limit = int(min(max(2 * (param_bytes + io_bytes) + (4 << 20), 16 << 20), 64 << 20))

    cost = pl.CostEstimate(
        flops=2 * B * (D_pad * HIDDEN + HIDDEN * OUT_DIM),
        transcendentals=B,  # one rsqrt per row
        bytes_accessed=B * D_pad * 4 + param_bytes + B * OUT_DIM * 4,
    )

    return pl.pallas_call(
        projection_head_kernel,
        out_shape=jax.ShapeDtypeStruct((B, OUT_DIM), jnp.float32),
        grid_spec=pltpu.PrefetchScalarGridSpec(
            num_scalar_prefetch=0,
            grid=grid,
            in_specs=[
                pl.BlockSpec((block_b_eff, D_pad), lambda i: (i, 0)),              # x tile
                pl.BlockSpec((D_pad, HIDDEN), lambda i: (0, 0),
                             pipeline_mode=resident),                              # W1 (resident)
                pl.BlockSpec((1, HIDDEN), lambda i: (0, 0),
                             pipeline_mode=resident),                              # b1
                pl.BlockSpec((HIDDEN, OUT_DIM), lambda i: (0, 0),
                             pipeline_mode=resident),                              # W2 (resident)
                pl.BlockSpec((1, OUT_DIM), lambda i: (0, 0),
                             pipeline_mode=resident),                              # b2
            ],
            out_specs=pl.BlockSpec((block_b_eff, OUT_DIM), lambda i: (i, 0)),
        ),
        compiler_params=pltpu.CompilerParams(
            dimension_semantics=("parallel",),
            vmem_limit_bytes=vmem_limit,
        ),
        cost_estimate=cost,
    )(x, w1, b1_2d, w2, b2_2d)


def reference(x, w1, b1, w2, b2):
    h = jnp.maximum(x @ w1 + b1, 0.0)
    y = jnp.maximum(h @ w2 + b2, 0.0)
    n = jnp.sqrt(jnp.sum(y * y, axis=-1, keepdims=True))
    return y / jnp.maximum(n, EPS)


if __name__ == "__main__":
    key = jax.random.PRNGKey(0)
    k_x, k_w1, k_b1, k_w2, k_b2 = jax.random.split(key, 5)

    batch = 20       # deliberately not a multiple of the batch tile (exercises masked edge tile)
    input_dim = 40   # deliberately not a multiple of 128 (exercises K-dim zero padding)

    # Deterministic synthetic parameters (shapes follow nn.Linear in the module,
    # with weights pre-transposed to [in, out]).
    x = jax.random.normal(k_x, (batch, input_dim), dtype=jnp.float32)
    w1 = jax.random.normal(k_w1, (input_dim, HIDDEN), dtype=jnp.float32) * 0.05
    b1 = jax.random.normal(k_b1, (HIDDEN,), dtype=jnp.float32) * 0.05
    w2 = jax.random.normal(k_w2, (HIDDEN, OUT_DIM), dtype=jnp.float32) * 0.05
    b2 = jax.random.normal(k_b2, (OUT_DIM,), dtype=jnp.float32) * 0.05

    out = projection_head(x, w1, b1, w2, b2)
    out = jax.block_until_ready(out)

    ref = reference(x, w1, b1, w2, b2)
    assert out.shape == (batch, OUT_DIM)
    assert jnp.allclose(out, ref, atol=1e-5, rtol=1e-5), "mismatch vs reference"

    print("KERNEL_OK")
</pallas_src>

<mosaic_0001>
module attributes {stable_mosaic.version = 11 : i64} {
  func.func @projection_head_kernel(%arg0: i32, %arg1: memref<16x128xf32, #tpu.memory_space<vmem>>, %arg2: memref<128x256xf32, #tpu.memory_space<vmem>>, %arg3: memref<1x256xf32, #tpu.memory_space<vmem>>, %arg4: memref<256x128xf32, #tpu.memory_space<vmem>>, %arg5: memref<1x128xf32, #tpu.memory_space<vmem>>, %arg6: memref<16x128xf32, #tpu.memory_space<vmem>>) attributes {dimension_semantics = [#tpu.dimension_semantics<parallel>], iteration_bounds = array<i64: 2>, scalar_prefetch = 0 : i64, scratch_operands = 0 : i64, tpu.core_type = #tpu.core_type<tc>, window_params = [{transform_indices = @transform_0, window_bounds = array<i64: 16, 128>}, {pipeline_mode = #tpu.pipeline_mode<synchronous>, transform_indices = @transform_1, window_bounds = array<i64: 128, 256>}, {pipeline_mode = #tpu.pipeline_mode<synchronous>, transform_indices = @transform_2, window_bounds = array<i64: 1, 256>}, {pipeline_mode = #tpu.pipeline_mode<synchronous>, transform_indices = @transform_3, window_bounds = array<i64: 256, 128>}, {pipeline_mode = #tpu.pipeline_mode<synchronous>, transform_indices = @transform_4, window_bounds = array<i64: 1, 128>}, {transform_indices = @transform_5, window_bounds = array<i64: 16, 128>}]} {
    %c0 = arith.constant 0 : index
    %c0_0 = arith.constant 0 : index
    %0 = vector.load %arg3[%c0, %c0_0] : memref<1x256xf32, #tpu.memory_space<vmem>>, vector<1x256xf32>
    %c0_1 = arith.constant 0 : index
    %c0_2 = arith.constant 0 : index
    %1 = vector.load %arg5[%c0_1, %c0_2] : memref<1x128xf32, #tpu.memory_space<vmem>>, vector<1x128xf32>
    %c0_3 = arith.constant 0 : index
    %c0_4 = arith.constant 0 : index
    %2 = vector.load %arg1[%c0_3, %c0_4] : memref<16x128xf32, #tpu.memory_space<vmem>>, vector<16x128xf32>
    %c0_5 = arith.constant 0 : index
    %c0_6 = arith.constant 0 : index
    %3 = vector.load %arg2[%c0_5, %c0_6] : memref<128x256xf32, #tpu.memory_space<vmem>>, vector<128x256xf32>
    %cst = arith.constant dense<0.000000e+00> : vector<16x256xf32>
    %4 = tpu.matmul %2, %3, %cst {dimension_numbers = #tpu.dot_dimension_numbers<[1], [0], [0], [1], [0, 0, 1, 1], [], []>} : vector<16x128xf32>, vector<128x256xf32>, vector<16x256xf32> -> vector<16x256xf32>
    %5 = vector.broadcast %0 : vector<1x256xf32> to vector<16x256xf32>
    %6 = arith.addf %4, %5 : vector<16x256xf32>
    %cst_7 = arith.constant 0.000000e+00 : f32
    %7 = vector.broadcast %cst_7 : f32 to vector<16x256xf32>
    %8 = arith.maximumf %6, %7 : vector<16x256xf32>
    %c0_8 = arith.constant 0 : index
    %c0_9 = arith.constant 0 : index
    %9 = vector.load %arg4[%c0_8, %c0_9] : memref<256x128xf32, #tpu.memory_space<vmem>>, vector<256x128xf32>
    %cst_10 = arith.constant dense<0.000000e+00> : vector<16x128xf32>
    %10 = tpu.matmul %8, %9, %cst_10 {dimension_numbers = #tpu.dot_dimension_numbers<[1], [0], [0], [1], [0, 0, 1, 1], [], []>} : vector<16x256xf32>, vector<256x128xf32>, vector<16x128xf32> -> vector<16x128xf32>
    %11 = vector.broadcast %1 : vector<1x128xf32> to vector<16x128xf32>
    %12 = arith.addf %10, %11 : vector<16x128xf32>
    %cst_11 = arith.constant 0.000000e+00 : f32
    %13 = vector.broadcast %cst_11 : f32 to vector<16x128xf32>
    %14 = arith.maximumf %12, %13 : vector<16x128xf32>
    %15 = arith.mulf %14, %14 : vector<16x128xf32>
    %cst_12 = arith.constant dense<0.000000e+00> : vector<16xf32>
    %16 = vector.multi_reduction <add>, %15, %cst_12 [1] : vector<16x128xf32> to vector<16xf32>
    %17 = vector.shape_cast %16 : vector<16xf32> to vector<16x1xf32>
    %cst_13 = arith.constant 1.000000e-24 : f32
    %18 = vector.broadcast %cst_13 : f32 to vector<16x1xf32>
    %19 = arith.maximumf %17, %18 : vector<16x1xf32>
    %20 = math.rsqrt %19 : vector<16x1xf32>
    %21 = vector.broadcast %20 : vector<16x1xf32> to vector<16x128xf32>
    %22 = arith.mulf %14, %21 : vector<16x128xf32>
    %c0_14 = arith.constant 0 : index
    %c0_15 = arith.constant 0 : index
    %23 = vector.load %arg6[%c0_14, %c0_15] : memref<16x128xf32, #tpu.memory_space<vmem>>, vector<16x128xf32>
    tpu.vector_store %arg6[%c0_14, %c0_15], %22 {strides = array<i32>} : memref<16x128xf32, #tpu.memory_space<vmem>>, vector<16x128xf32>,
    return
  }
  func.func @transform_0(%arg0: i32) -> (i32, i32) {
    %c0_i32 = arith.constant 0 : i32
    %c0_i32_0 = arith.constant 0 : i32
    return %arg0, %c0_i32 : i32, i32
  }
  func.func @transform_1(%arg0: i32) -> (i32, i32) {
    %c0_i32 = arith.constant 0 : i32
    %c0_i32_0 = arith.constant 0 : i32
    %c0_i32_1 = arith.constant 0 : i32
    return %c0_i32, %c0_i32_0 : i32, i32
  }
  func.func @transform_2(%arg0: i32) -> (i32, i32) {
    %c0_i32 = arith.constant 0 : i32
    %c0_i32_0 = arith.constant 0 : i32
    %c0_i32_1 = arith.constant 0 : i32
    return %c0_i32, %c0_i32_0 : i32, i32
  }
  func.func @transform_3(%arg0: i32) -> (i32, i32) {
    %c0_i32 = arith.constant 0 : i32
    %c0_i32_0 = arith.constant 0 : i32
    %c0_i32_1 = arith.constant 0 : i32
    return %c0_i32, %c0_i32_0 : i32, i32
  }
  func.func @transform_4(%arg0: i32) -> (i32, i32) {
    %c0_i32 = arith.constant 0 : i32
    %c0_i32_0 = arith.constant 0 : i32
    %c0_i32_1 = arith.constant 0 : i32
    return %c0_i32, %c0_i32_0 : i32, i32
  }
  func.func @transform_5(%arg0: i32) -> (i32, i32) {
    %c0_i32 = arith.constant 0 : i32
    %c0_i32_0 = arith.constant 0 : i32
    return %arg0, %c0_i32 : i32, i32
  }
}

</mosaic_0001>

<bundles_post_ra>
// kernel: tpu_custom_call.1
= control target key start
LH: loop header
LB: loop body
LE: loop exit
PB: predicated region body
PF: predicated region fallthrough
CT: control target
= control target key end

     0   :  { %10 = vsyncpa [#allocation3], 0  ;;  %s1321_s0 = inlined_call_operand.hbm [shape: f32[20,128], index: 0, kind: input, shape index: {}]   ;;  %s1322_s1 = inlined_call_operand.hbm [shape: f32[128,256], index: 1, kind: input, shape index: {}]   ;;  %s1323_s2 = inlined_call_operand.vmem [shape: f32[1,256], index: 2, kind: input, shape index: {}]   ;;  %s1324_s3 = inlined_call_operand.hbm [shape: f32[256,128], index: 3, kind: input, shape index: {}]   ;;  %s1325_s4 = inlined_call_operand.vmem [shape: f32[1,128], index: 4, kind: input, shape index: {}]   ;;  %s1326_s5 = inlined_call_operand.hbm [shape: f32[20,128], index: 5, kind: output, shape index: {}]  }
   0x1   :  { %12 = vsyncpa [#allocation3 + $0x1], 0 }
   0x2   :  { %13 = vsyncpa [#allocation6], 0 }
   0x3   :  { %14 = vsyncpa [#allocation4], 0 }
   0x4   :  { %16 = vsyncpa [#allocation4 + $0x1], 0  ;;  %s1060_s18 = smov 0   ;;  %s1062_s19 = smov 0  }
   0x5   :  { %s1064_s20 = smov 0   ;;  %s1066_s21 = smov 0  }
   0x6 LB: > { %s1081_s22 = sadd.s32 4294967295, %s1015_s21   ;;  %s657_s23 = sadd.s32 4294967294, %s1015_s21   ;;  %s1015_s21 = sphi %s1066_s21, %s1348_s21   ;;  %s1011_s20 = sphi %s1064_s20, %s1347_s20   ;;  %s1007_s19 = sphi %s1062_s19, %s1346_s19   ;;  %s1003_s18 = sphi %s1060_s18, %s1345_s18  }
   0x7   : > { %s1085_s24 = sadd.s32 1, %s1015_s21   ;;  %s29_s25 = sadd.s32 1, %s1011_s20 }
   0x8   : > { %s26_s26 = ssub.s32 %s1015_s21, %s1085_s24  ;;  %p36_p0 = scmp.ne.s32.totalorder %s1011_s20, %s1007_s19 }
   0x9   : > { %p27_p1 = scmp.eq.s32.totalorder %s26_s26, 0  ;;  %p37_p2 = scmp.eq.s32.totalorder %s1015_s21, 0 }
   0xa   : > { %p42_p3 = scmp.ne.s32.totalorder %s1007_s19, %s1003_s18  ;;  %p1327_p4 = scmp.eq.s32.totalorder %s1081_s22, 0 }
   0xb   : > { %s1097_s27 = scalar_select %p27_p1, %s1011_s20, %s29_s25  }
   0xc   : > { %p1099_p5 = por %p37_p2, %p36_p0  ;;  %p1105_p6 = por %p1327_p4, %p42_p3 }
   0xd   : > { %1330 = sst [smem:[#allocation12_spill]] %s1097_s27  ;;  %p150_p7 = scmp.eq.s32.totalorder %s1081_s22, 1 }
   0xe   : > { %s1331_s28 = scalar_select %p1099_p5, 1, 0 }
   0xf   : > { %s1332_s29 = scalar_select %p1105_p6, 1, 0 }
  0x10   : > { %p156_p8 = scmp.eq.s32.totalorder %s657_s23, 1  ;;  %p658_p9 = scmp.ge.s32.totalorder %s1015_s21, 1 }
  0x11   : > { %p163_p10 = scmp.lt.s32.totalorder %s1015_s21, 3  ;;  %p1112_p11 = por %p150_p7, %p36_p0 }
  0x12   : > { %p1116_p12 = por %p156_p8, %p42_p3  ;;  %s1017_s8 = smov [#allocation5]  }
  0x13   : > { %s1333_s30 = scalar_select %p1112_p11, 1, 0 }
  0x14   : > { %s1334_s6 = scalar_select %p1116_p12, 1, 0 }
  0x15   : > { %p1120_p13 = pnand %p658_p9, %p163_p10  ;;  %s175_s9 = sshll.u32 %s1017_s8, 4  ;;  %s176_s9 = int_to_ptr.vmem [resolvable:$true] %s175_s9 }
  0x16   : > { %s1018_s11 = smov [#allocation7]   ;;  %s861_s15 = scalar_lea.hbm %s1322_s1, 4096 }
  0x17   : > { %s1335_s7 = scalar_select %p1120_p13, 1, 0 }
  0x18   : > { %p798_p1 = pneg %p1120_p13  ;;  %s191_s12 = sshll.u32 %s1018_s11, 4  ;;  %s1132_s12 = int_to_ptr.vmem [resolvable:$true] %s191_s12 }
  0x19   : > { %p862_p0 = scmp.ne.s32.totalorder %s1322_s1, %s861_s15  ;;  %p868_p9 = scmp.lt.u32.totalorder %s861_s15, %s1322_s1 }
  0x1a   : > { %p1128_p2 = pnand %p798_p1, %p1327_p4 }
  0x1c   : > { %p863_p3 = pneg %p1128_p2 }
  0x1e   : > { %p864_p7 = pnand %p863_p3, %p862_p0 }
  0x20   : > { %p865_p8 = pneg %p864_p7 }
  0x22   : > { %p870_p10 = pnand %p868_p9, %p865_p8 }
  0x24   : > { %873 = shalt.err (!%p870_p10)
}
  0x25   : > { %s874_s26 = scalar_lea.vmem %s176_s9, 4096  ;;  %p882_p11 = scmp.lt.s32.totalorder %s176_s9, %s176_s9 }
  0x26   : > { %p875_p1 = scmp.ne.s32.totalorder %s176_s9, %s874_s26  ;;  %p883_p6 = scmp.lt.s32.totalorder %s874_s26, %s874_s26 }
  0x28   : > { %p877_p4 = pnand %p875_p1, %p863_p3  ;;  %p884_p13 = por %p883_p6, %p882_p11 }
  0x2a   : > { %p878_p12 = pneg %p877_p4 }
  0x2c   : > { %p885_p5 = pnand %p884_p13, %p878_p12 }
  0x2e   : > { %888 = shalt.err (!%p885_p5)
}
  0x2f   : > { %s1019_s8 = smov 256   ;;  %s1020_s11 = smov 16  }
  0x30   : > { %801 = dma.hbm_to_vmem [thread:$0]  (!%p1128_p2), %s1322_s1, 4096, %s176_s9, [#allocation6], %s1019_s8, %s1019_s8, %s1020_s11  }
  0x31   : > { %s889_s17 = scalar_lea.hbm %s1324_s3, 4096 }
  0x32   : > { %p890_p4 = scmp.ne.s32.totalorder %s1324_s3, %s889_s17  ;;  %p896_p11 = scmp.lt.u32.totalorder %s889_s17, %s1324_s3 }
  0x34   : > { %p892_p5 = pnand %p890_p4, %p863_p3 }
  0x36   : > { %p893_p6 = pneg %p892_p5 }
  0x38   : > { %p898_p12 = pnand %p896_p11, %p893_p6 }
  0x3a   : > { %901 = shalt.err (!%p898_p12)
}
  0x3b   : > { %s902_s9 = scalar_lea.vmem %s1132_s12, 4096  ;;  %p910_p8 = scmp.lt.s32.totalorder %s1132_s12, %s1132_s12 }
  0x3c   : > { %p903_p13 = scmp.ne.s32.totalorder %s1132_s12, %s902_s9  ;;  %p911_p9 = scmp.lt.s32.totalorder %s902_s9, %s902_s9 }
  0x3e   : > { %p905_p0 = pnand %p903_p13, %p863_p3  ;;  %p912_p10 = por %p911_p9, %p910_p8 }
  0x40   : > { %p906_p7 = pneg %p905_p0 }
  0x42   : > { %p913_p1 = pnand %p912_p10, %p906_p7 }
  0x44   : > { %916 = shalt.err (!%p913_p1)
}
  0x45   : > { %s1021_s27 = smov 128   ;;  %s1022_s8 = smov 8  }
  0x46   : > { %804 = dma.hbm_to_vmem [thread:$0]  (!%p1128_p2), %s1324_s3, 4096, %s1132_s12, [#allocation6], %s1021_s27, %s1021_s27, %s1022_s8  }
  0x47   : > { %p661_p4 = scmp.ge.s32.totalorder %s1015_s21, 2 }
  0x48   : > { %p1337_p3 = scmp.ne.s32.totalorder (!%p661_p4), %s1331_s28, 0 }
  0x49   : > { %204 = sbr.rel (%p661_p4) target bundleno = 115 (0x73), region = 32 }
  0x50   : > { %207 = sbr.rel (!%p1337_p3) target bundleno = 115 (0x73), region = 36  ;;  %s208_s14 = sand.u32 (%p1337_p3), 1, %s1011_s20  }
  0x51   : > { %s663_s15 = sshll.u32 (%p1337_p3), %s1015_s21, 1  ;;  %s662_s16 = sshll.u32 (%p1337_p3), %s208_s14, 4 }
  0x52   : > { %s214_s17 = ssub.s32 (%p1337_p3), 3, %s663_s15  ;;  %s1191_s23 = scalar_lea.sflag (%p1337_p3), [#allocation3], %s208_s14 }
  0x53   : > { %p215_p5 = scmp.lt.s32.totalorder (%p1337_p3), %s214_s17, 2  ;;  %s212_s25 = scalar_lea.vmem (%p1337_p3), [#allocation2], %s662_s16 }
  0x57   : > { %s1350_s17 = smov (!%p215_p5, %s214_s17), 2 }
  0x58   : > { %s1188_s10 = sshll.u32 %s1350_s17, 7 }
  0x59   : > { %s219_s12 = ssub.s32 256, %s1188_s10 }
  0x5a   : > { %220 = vsyncadd %s1191_s23, %s219_s12  ;;  %p665_p2 = scmp.ne.s32.totalorder %s1188_s10, 0  ;;  %s684_s28 = sshll.u32 %s1015_s21, 8 }
  0x5b   : > { %s1199_s27 = scalar_lea.hbm %s1321_s0, %s684_s28  ;;  %s225_s8 = sshll.u32 %s212_s25, 4  ;;  %s1201_s8 = int_to_ptr.vmem [resolvable:$true] %s225_s8 }
  0x5c   : > { %s917_s11 = scalar_lea.hbm %s1199_s27, %s1188_s10  ;;  %s921_s15 = scalar_lea.hbm %s1321_s0, 384 }
  0x5d   : > { %p918_p6 = scmp.ne.s32.totalorder %s1199_s27, %s917_s11  ;;  %p922_p13 = scmp.lt.u32.totalorder %s1199_s27, %s1321_s0 }
  0x5e   : > { %p923_p0 = scmp.lt.u32.totalorder %s921_s15, %s917_s11  ;;  %p925_p8 = scmp.lt.u32.totalorder %s917_s11, %s1199_s27 }
  0x5f   : > { %p919_p11 = pnand %p918_p6, %p665_p2 }
  0x60   : > { %p924_p7 = por %p923_p0, %p922_p13 }
  0x61   : > { %p920_p12 = pneg %p919_p11 }
  0x62   : > { %p926_p9 = por %p925_p8, %p924_p7 }
  0x64   : > { %p927_p10 = pnand %p926_p9, %p920_p12 }
  0x66   : > { %930 = shalt.err (!%p927_p10)
}
  0x67   : > { %s931_s12 = scalar_lea.vmem %s1201_s8, %s1188_s10  ;;  %s1023_s25 = smov [#allocation2]  }
  0x68   : > { %p932_p1 = scmp.ne.s32.totalorder %s1201_s8, %s931_s12  ;;  %s935_s28 = sshll.u32 %s1023_s25, 4  ;;  %s936_s28 = int_to_ptr.vmem [resolvable:$false] %s935_s28 }
  0x69   : > { %s937_s26 = scalar_lea.vmem %s936_s28, 512  ;;  %p938_p6 = scmp.lt.s32.totalorder %s1201_s8, %s936_s28 }
  0x6a   : > { %p933_p3 = pnand %p932_p1, %p665_p2  ;;  %p939_p11 = scmp.lt.s32.totalorder %s937_s26, %s931_s12 }
  0x6c   : > { %p934_p5 = pneg %p933_p3  ;;  %p940_p13 = por %p939_p11, %p938_p6 }
  0x6e   : > { %p941_p0 = pnand %p940_p13, %p934_p5 }
  0x70   : > { %944 = shalt.err (!%p941_p0)
}
  0x71   : > { %s1024_s9 = smov 128   ;;  %s1025_s11 = smov 8  }
  0x72   : > { %231 = dma.hbm_to_vmem [thread:$0]  (%p665_p2), %s1199_s27, %s1188_s10, %s1201_s8, %s1191_s23, %s1024_s9, %s1024_s9, %s1025_s11  }
  0x73 PF: > { %p1338_p12 = scmp.ne.s32.totalorder %s1335_s7, 0 }
  0x74   : > { %s1231_s13 = sand.u32 (!%p1338_p12), 1, %s1007_s19   ;;  %p1339_p7 = scmp.ne.s32.totalorder (!%p1338_p12), %s1332_s29, 0 }
  0x75   : > { %237 = sbr.rel (%p1338_p12) target bundleno = 792 (0x318), region = 40  ;;  %s670_s14 = sshll.u32 (!%p1338_p12), %s1231_s13, 4 }
  0x76   : > { %s240_s15 = scalar_lea.sflag (!%p1338_p12), [#allocation3], %s1231_s13  ;;  %s1237_s16 = scalar_lea.vmem (!%p1338_p12), [#allocation2], %s670_s14 }
  0x7c   : > { %990 = dma.done.wait (%p1339_p7), %s240_s15, 256  }
  0x7d   : > { %992 = vsyncadd (%p1339_p7), %s240_s15, 4294967040  ;;  %p1340_p2 = scmp.eq.s32.totalorder %s1081_s22, 0 }
  0x7f   : > { %994 = dma.done.wait (%p1340_p2), [#allocation6], 8192   ;;  %p1341_p8 = pmov %p1340_p2 }
  0x80   : > { %v1026_v0 = vmov 0.0   ;;  %v293_v1 = vld [vmem:[#allocation5 + $0x8] sm:$0xff]  ;;  %v295_v2 = vld [vmem:[#allocation5 + $0x18] sm:$0xff]  ;;  %v292_v3 = vld [vmem:[#allocation5] sm:$0xff]  ;;  %s277_s27 = scalar_lea.vmem [#allocation8], %s670_s14  ;;  %s546_s8 = scalar_lea.sflag [#allocation4], %s1231_s13 }
  0x81   : > { %996 = vsyncadd (%p1341_p8), [#allocation6], 4294959104  ;;  %399 = vmatprep.mubr.f32.mxu0 %v1026_v0  ;;  %v724_v4 = vpack.c.bf16 %v295_v2, %v293_v1  ;;  %v294_v5 = vld [vmem:[#allocation5 + $0x10] sm:$0xff]  ;;  %v297_v6 = vld [vmem:[#allocation5 + $0x28] sm:$0xff]  ;;  %p1342_p9 = scmp.ne.s32.totalorder %s1333_s30, 0 }
  0x82   : > { %v299_v7 = vld [vmem:[#allocation5 + $0x38] sm:$0xff]  ;;  %v726_v8 = vpack.c.bf16 %v294_v5, %v292_v3  ;;  %v296_v10 = vld [vmem:[#allocation5 + $0x20] sm:$0xff]  ;;  %v298_v11 = vld [vmem:[#allocation5 + $0x30] sm:$0xff]  ;;  %s676_s17 = sshll.u32 (%p1342_p9), %s1081_s22, 1 }
  0x83   : > { %v728_v9 = vpack.c.bf16 %v299_v7, %v297_v6  ;;  %v301_v12 = vld [vmem:[#allocation5 + $0x48] sm:$0xff]  ;;  %725 = vmatprep.subr.bf16.mxu0 %v724_v4  ;;  %v303_v13 = vld [vmem:[#allocation5 + $0x58] sm:$0xff]  ;;  %v730_v14 = vpack.c.bf16 %v298_v11, %v296_v10  ;;  %v300_v16 = vld [vmem:[#allocation5 + $0x40] sm:$0xff]  ;;  %s554_s12 = ssub.s32 (%p1342_p9), 3, %s676_s17 }
  0x84   : > { %727 = vmatpush1.bf16.msra.mxu0 %v726_v8  ;;  %v732_v15 = vpack.c.bf16 %v303_v13, %v301_v12  ;;  %v302_v17 = vld [vmem:[#allocation5 + $0x50] sm:$0xff]  ;;  %v305_v18 = vld [vmem:[#allocation5 + $0x68] sm:$0xff]  ;;  %v307_v19 = vld [vmem:[#allocation5 + $0x78] sm:$0xff]  ;;  %p555_p10 = scmp.lt.s32.totalorder (%p1342_p9), %s554_s12, 2 }
  0x85   : > { %729 = vmatprep.subr.bf16.mxu0 %v728_v9  ;;  %v734_v20 = vpack.c.bf16 %v302_v17, %v300_v16  ;;  %v736_v21 = vpack.c.bf16 %v307_v19, %v305_v18  ;;  %v304_v22 = vld [vmem:[#allocation5 + $0x60] sm:$0xff]  ;;  %v306_v23 = vld [vmem:[#allocation5 + $0x70] sm:$0xff]  ;;  %v309_v24 = vld [vmem:[#allocation5 + $0x88] sm:$0xff] }
  0x86   : > { %v311_v25 = vld [vmem:[#allocation5 + $0x98] sm:$0xff]  ;;  %v308_v26 = vld [vmem:[#allocation5 + $0x80] sm:$0xff]  ;;  %v310_v27 = vld [vmem:[#allocation5 + $0x90] sm:$0xff]  ;;  %v738_v30 = vpack.c.bf16 %v306_v23, %v304_v22 }
  0x87   : > { %v432_v28 = vld [vmem:[#allocation7 + $0x80] sm:$0xff]  ;;  %v433_v29 = vld [vmem:[#allocation7 + $0x88] sm:$0xff]  ;;  %v434_v35 = vld [vmem:[#allocation7 + $0x90] sm:$0xff]  ;;  %v740_v36 = vpack.c.bf16 %v311_v25, %v309_v24  ;;  %v742_v46 = vpack.c.bf16 %v310_v27, %v308_v26 }
  0x88   : > { %731 = vmatpush1.bf16.msra.mxu0 %v730_v14  ;;  %v313_v31 = vld [vmem:[#allocation5 + $0xa8] sm:$0xff]  ;;  %v756_v32 = vpack.c.bf16 %v433_v29, %v432_v28  ;;  %v416_v33 = vld [vmem:[#allocation7] sm:$0xff]  ;;  %v435_v38 = vld [vmem:[#allocation7 + $0x98] sm:$0xff] }
  0x89   : > { %733 = vmatprep.subr.bf16.mxu0 %v732_v15  ;;  %v417_v34 = vld [vmem:[#allocation7 + $0x8] sm:$0xff]  ;;  %v418_v39 = vld [vmem:[#allocation7 + $0x10] sm:$0xff]  ;;  %v419_v40 = vld [vmem:[#allocation7 + $0x18] sm:$0xff]  ;;  %v760_v42 = vpack.c.bf16 %v435_v38, %v434_v35 }
  0x8a   : > { %v758_v37 = vpack.c.bf16 %v417_v34, %v416_v33  ;;  %v315_v41 = vld [vmem:[#allocation5 + $0xb8] sm:$0xff]  ;;  %757 = vmatprep.subr.bf16.mxu1 %v756_v32  ;;  %v436_v43 = vld [vmem:[#allocation7 + $0xa0] sm:$0xff]  ;;  %v437_v44 = vld [vmem:[#allocation7 + $0xa8] sm:$0xff]  ;;  %v762_v45 = vpack.c.bf16 %v419_v40, %v418_v39 }
  0x8b   : > { %v312_v47 = vld [vmem:[#allocation5 + $0xa0] sm:$0xff]  ;;  %v764_v48 = vpack.c.bf16 %v437_v44, %v436_v43  ;;  %v421_v50 = vld [vmem:[#allocation7 + $0x28] sm:$0xff]  ;;  %v744_v51 = vpack.c.bf16 %v315_v41, %v313_v31  ;;  %v314_v52 = vld [vmem:[#allocation5 + $0xb0] sm:$0xff] }
  0x8c   : > { %735 = vmatpush1.bf16.msra.mxu0 %v734_v20  ;;  %759 = vmatpush3.bf16.msra.mxu1 %v758_v37  ;;  %v420_v49 = vld [vmem:[#allocation7 + $0x20] sm:$0xff]  ;;  %v438_v53 = vld [vmem:[#allocation7 + $0xb0] sm:$0xff]  ;;  %v439_v54 = vld [vmem:[#allocation7 + $0xb8] sm:$0xff]  ;;  %v746_v58 = vpack.c.bf16 %v314_v52, %v312_v47 }
  0x8d   : > { %737 = vmatprep.subr.bf16.mxu0 %v736_v21  ;;  %761 = vmatprep.subr.bf16.mxu1 %v760_v42  ;;  %v317_v55 = vld [vmem:[#allocation5 + $0xc8] sm:$0xff]  ;;  %v319_v56 = vld [vmem:[#allocation5 + $0xd8] sm:$0xff]  ;;  %v766_v57 = vpack.c.bf16 %v421_v50, %v420_v49  ;;  %v316_v59 = vld [vmem:[#allocation5 + $0xc0] sm:$0xff]  ;;  %v768_v60 = vpack.c.bf16 %v439_v54, %v438_v53 }
  0x8e   : > { %v422_v61 = vld [vmem:[#allocation7 + $0x30] sm:$0xff]  ;;  %v423_v62 = vld [vmem:[#allocation7 + $0x38] sm:$0xff]  ;;  %v748_v63 = vpack.c.bf16 %v319_v56, %v317_v55  ;;  %v440_v2 = vld [vmem:[#allocation7 + $0xc0] sm:$0xff] }
  0x8f   : > { %v318_v1 = vld [vmem:[#allocation5 + $0xd0] sm:$0xff]  ;;  %v441_v3 = vld [vmem:[#allocation7 + $0xc8] sm:$0xff]  ;;  %v323_v5 = vld [vmem:[#allocation5 + $0xf8] sm:$0xff]  ;;  %v770_v6 = vpack.c.bf16 %v423_v62, %v422_v61 }
  0x90   : > { %739 = vmatpush1.bf16.msra.mxu0 %v738_v30  ;;  %763 = vmatpush3.bf16.msra.mxu1 %v762_v45  ;;  %v321_v4 = vld [vmem:[#allocation5 + $0xe8] sm:$0xff]  ;;  %v750_v7 = vpack.c.bf16 %v318_v1, %v316_v59  ;;  %v320_v8 = vld [vmem:[#allocation5 + $0xe0] sm:$0xff]  ;;  %v772_v9 = vpack.c.bf16 %v441_v3, %v440_v2  ;;  %v322_v13 = vld [vmem:[#allocation5 + $0xf0] sm:$0xff] }
  0x91   : > { %741 = vmatprep.subr.bf16.mxu0 %v740_v36  ;;  %765 = vmatprep.subr.bf16.mxu1 %v764_v48  ;;  %v424_v10 = vld [vmem:[#allocation7 + $0x40] sm:$0xff]  ;;  %v425_v11 = vld [vmem:[#allocation7 + $0x48] sm:$0xff]  ;;  %v752_v12 = vpack.c.bf16 %v323_v5, %v321_v4  ;;  %v442_v14 = vld [vmem:[#allocation7 + $0xd0] sm:$0xff]  ;;  %v754_v17 = vpack.c.bf16 %v322_v13, %v320_v8  ;;  %v325_v36 = vlaneseq }
  0x92   : > { %v443_v15 = vld [vmem:[#allocation7 + $0xd8] sm:$0xff]  ;;  %v774_v16 = vpack.c.bf16 %v425_v11, %v424_v10  ;;  %v426_v19 = vld [vmem:[#allocation7 + $0x50] sm:$0xff]  ;;  %v444_v21 = vld [vmem:[#allocation7 + $0xe0] sm:$0xff] }
  0x93   : > { %v776_v18 = vpack.c.bf16 %v443_v15, %v442_v14  ;;  %v427_v20 = vld [vmem:[#allocation7 + $0x58] sm:$0xff]  ;;  %v445_v22 = vld [vmem:[#allocation7 + $0xe8] sm:$0xff]  ;;  %v290_v24 = vld [vmem:[%s1237_s16] sm:$0xff]  ;;  %v326_v37 = vshrl.u32 %v325_v36, 7 }
  0x94   : > { %743 = vmatpush1.bf16.msra.mxu0 %v742_v46  ;;  %767 = vmatpush3.bf16.msra.mxu1 %v766_v57  ;;  %v778_v23 = vpack.c.bf16 %v427_v20, %v426_v19  ;;  %v780_v25 = vpack.c.bf16 %v445_v22, %v444_v21  ;;  %v291_v26 = vld [vmem:[%s1237_s16 + $0x8] sm:$0xff]  ;;  %v428_v27 = vld [vmem:[#allocation7 + $0x60] sm:$0xff]  ;;  %v446_v30 = vld [vmem:[#allocation7 + $0xf0] sm:$0xff] }
  0x95   : > { %745 = vmatprep.subr.bf16.mxu0 %v744_v51  ;;  %769 = vmatprep.subr.bf16.mxu1 %v768_v60  ;;  %v429_v28 = vld [vmem:[#allocation7 + $0x68] sm:$0xff]  ;;  %v447_v31 = vld [vmem:[#allocation7 + $0xf8] sm:$0xff]  ;;  %v430_v33 = vld [vmem:[#allocation7 + $0x70] sm:$0xff]  ;;  %v327_v38 = vsub.s32 0, %v326_v37  ;;  %v331_v39 = vsub.s32 1, %v326_v37 }
  0x96   : > { %v782_v29 = vpack.c.bf16 %v429_v28, %v428_v27  ;;  %v784_v32 = vpack.c.bf16 %v447_v31, %v446_v30  ;;  %v431_v34 = vld [vmem:[#allocation7 + $0x78] sm:$0xff]  ;;  %v674_v56 = vld [vmem:[%s1325_s4] ss:$0 sm:$0xff] }
  0x97   : > { %v786_v35 = vpack.c.bf16 %v431_v34, %v430_v33 }
  0x98   : > { %747 = vmatpush1.bf16.msra.mxu0 %v746_v58  ;;  %771 = vmatpush3.bf16.msra.mxu1 %v770_v6 }
  0x99   : > { %749 = vmatprep.subr.bf16.mxu0 %v748_v63  ;;  %773 = vmatprep.subr.bf16.mxu1 %v772_v9 }
  0x9c   : > { %751 = vmatpush1.bf16.msra.mxu0 %v750_v7  ;;  %775 = vmatpush3.bf16.msra.mxu1 %v774_v16 }
  0x9d   : > { %753 = vmatprep.subr.bf16.mxu0 %v752_v12  ;;  %777 = vmatprep.subr.bf16.mxu1 %v776_v18 }
  0xa0   : > { %755 = vmatpush1.bf16.msra.mxu0 %v754_v17  ;;  %779 = vmatpush3.bf16.msra.mxu1 %v778_v23 }
  0xa1   : > { %781 = vmatprep.subr.bf16.mxu1 %v780_v25 }
  0xa3   : > { %400 = vmatmul.mubr.f32.vlgmr.msra.gmra.mrb[0].mxu0 %v290_v24 }
  0xa4   : > { %405 = vmatprep.mubr.f32.mxu0 %v1026_v0  ;;  %783 = vmatpush3.bf16.msra.mxu1 %v782_v29  ;;  %v288_v0 = vld [vmem:[%s1323_s2] sm:$0x3] }
  0xa5   : > { %785 = vmatprep.subr.bf16.mxu1 %v784_v32  ;;  %v328_v40 = vrot.slane %v288_v0, %v327_v38  ;;  %v332_v41 = vrot.slane %v288_v0, %v331_v39 }
  0xa7   : > { %406 = vmatmul.mubr.f32.gmra.mrb[2].mxu0 %v291_v26 }
  0xa8   : > { %787 = vmatpush3.bf16.msra.mxu1 %v786_v35 }
 0x176   : > { %v401_v42 = vpop.f32.mrb[0].mxu0 }
 0x177   : > { %v402_v43 = vadd.f32 %v401_v42, %v328_v40  ;;  %v403_v44 = vpop.f32.mrb[1].mxu0 }
 0x178   : > { %v404_v45 = vadd.f32 %v403_v44, %v332_v41 }
 0x179   : > { %v412_v48 = vmax.f32 %v402_v43, 0.0 }
 0x17a   : > { %v407_v46 = vpop.f32.mrb[2].mxu0  ;;  %v413_v47 = vmax.f32 %v404_v45, 0.0 }
 0x17b   : > { %v408_v49 = vadd.f32 %v407_v46, %v328_v40  ;;  %v409_v50 = vpop.f32.mrb[3].mxu0 }
 0x17c   : > { %v410_v51 = vadd.f32 %v409_v50, %v332_v41  ;;  %518 = vmatprep.mubr.f32.mxu1 %v413_v47 }
 0x17d   : > { %519 = vmatmul.mubr.f32.vlgmr.msra.gmra.mrb[0].mxu1 %v412_v48  ;;  %v414_v53 = vmax.f32 %v408_v49, 0.0 }
 0x17e   : > { %v415_v52 = vmax.f32 %v410_v51, 0.0 }
 0x180   : > { %523 = vmatprep.mubr.f32.mxu1 %v415_v52 }
 0x181   : > { %524 = vmatmul.mubr.f32.gmra.mrb[2].mxu1 %v414_v53 }
 0x250   : > { %v718_v54 = vpop.f32.mrb[0].mxu1 }
 0x251   : > { %v719_v55 = vpop.f32.mrb[1].mxu1 }
 0x252   : > { %v720_v57 = vadd.f32 %v719_v55, %v718_v54 }
 0x254   : > { %v721_v58 = vpop.f32.mrb[2].mxu1  ;;  %v521_v59 = vadd.f32 %v720_v57, %v674_v56 }
 0x255   : > { %v722_v60 = vpop.f32.mrb[3].mxu1 }
 0x256   : > { %v723_v61 = vadd.f32 %v722_v60, %v721_v58  ;;  %v529_v62 = vmax.f32 %v521_v59, 0.0 }
 0x258   : > { %v526_v63 = vadd.f32 %v723_v61, %v674_v56  ;;  %v531_v1 = vmul.f32 %v529_v62, %v529_v62 }
 0x25a   : > { %v530_v2 = vmax.f32 %v526_v63, 0.0  ;;  %533 = vadd.xlane.f32.xlu0 %v531_v1 }
 0x25c   : > { %v532_v3 = vmul.f32 %v530_v2, %v530_v2 }
 0x25e   : > { %535 = vadd.xlane.f32.xlu0 %v532_v3 }
 0x2e7   : > { %v534_v4 = vpop.xlane.xlu0 %533 }
 0x2e8   : > { %v537_v5 = vmax.f32 %v534_v4, 1e-24 }
 0x2ea   : > { %857 = vrsqrt.f32 %v537_v5 }
 0x2eb   : > { %v536_v6 = vpop.xlane.xlu0 %535 }
 0x2ec   : > { %v538_v7 = vmax.f32 %v536_v6, 1e-24 }
 0x2ee   : > { %859 = vrsqrt.f32 %v538_v7 }
 0x2f4   : > { %v858_v8 = vpop.eup %857 }
 0x2f5   : > { %v541_v9 = vmul.f32 %v858_v8, %v529_v62  ;;  %552 = sbr.rel (!%p1342_p9) target bundleno = 792 (0x318), region = 56 }
 0x2f7   : > { %543 = vst [vmem:[%s277_s27] sm:$0xff] %v541_v9 }
 0x2f8   : > { %v860_v10 = vpop.eup %859 }
 0x2f9   : > { %v542_v11 = vmul.f32 %v860_v10, %v530_v2 }
 0x2fb   : > { %544 = vst [vmem:[%s277_s27 + $0x8] sm:$0xff] %v542_v11 }
 0x2fc   : > { %s1352_s12 = smov (!%p555_p10, %s554_s12), 2 }
 0x2fd   : > { %s1263_s25 = sshll.u32 %s1352_s12, 7 }
 0x2fe   : > { %s559_s28 = ssub.s32 256, %s1263_s25 }
 0x2ff   : > { %560 = vsyncadd %s546_s8, %s559_s28  ;;  %p678_p1 = scmp.ne.s32.totalorder %s1263_s25, 0  ;;  %s685_s26 = sshll.u32 %s1081_s22, 8 }
 0x300   : > { %s1273_s11 = scalar_lea.hbm %s1326_s5, %s685_s26  ;;  %s565_s14 = sshll.u32 %s277_s27, 4  ;;  %s1275_s14 = int_to_ptr.vmem [resolvable:$true] %s565_s14 }
 0x301   : > { %s945_s15 = scalar_lea.vmem %s1275_s14, %s1263_s25  ;;  %s1027_s16 = smov [#allocation8]  }
 0x302   : > { %p946_p3 = scmp.ne.s32.totalorder %s1275_s14, %s945_s15  ;;  %s949_s29 = sshll.u32 %s1027_s16, 4  ;;  %s950_s29 = int_to_ptr.vmem [resolvable:$false] %s949_s29 }
 0x303   : > { %s951_s22 = scalar_lea.vmem %s950_s29, 512  ;;  %p952_p11 = scmp.lt.s32.totalorder %s1275_s14, %s950_s29 }
 0x304   : > { %p947_p5 = pnand %p946_p3, %p678_p1  ;;  %p953_p13 = scmp.lt.s32.totalorder %s951_s22, %s945_s15 }
 0x306   : > { %p948_p6 = pneg %p947_p5  ;;  %p954_p0 = por %p953_p13, %p952_p11 }
 0x308   : > { %p955_p12 = pnand %p954_p0, %p948_p6 }
 0x30a   : > { %958 = shalt.err (!%p955_p12)
}
 0x30b   : > { %s959_s7 = scalar_lea.hbm %s1273_s11, %s1263_s25  ;;  %s963_s27 = scalar_lea.hbm %s1326_s5, 384 }
 0x30c   : > { %p960_p7 = scmp.ne.s32.totalorder %s1273_s11, %s959_s7  ;;  %p964_p9 = scmp.lt.u32.totalorder %s1273_s11, %s1326_s5 }
 0x30d   : > { %p965_p10 = scmp.lt.u32.totalorder %s963_s27, %s959_s7  ;;  %p967_p5 = scmp.lt.u32.totalorder %s959_s7, %s1273_s11 }
 0x30e   : > { %p961_p2 = pnand %p960_p7, %p678_p1 }
 0x30f   : > { %p966_p3 = por %p965_p10, %p964_p9 }
 0x310   : > { %p962_p8 = pneg %p961_p2 }
 0x311   : > { %p968_p6 = por %p967_p5, %p966_p3 }
 0x313   : > { %p969_p11 = pnand %p968_p6, %p962_p8 }
 0x315   : > { %972 = shalt.err (!%p969_p11)
}
 0x316   : > { %s1028_s28 = smov 128   ;;  %s1029_s26 = smov 8  }
 0x317   : > { %571 = dma.vmem_to_hbm [thread:$0]  (%p678_p1), %s1275_s14, %s1263_s25, %s1273_s11, %s546_s8, %s1028_s28, %s1028_s28, %s1029_s26  }
 0x318 PF: > { %s580_s30 = sand.u32 1, %s1003_s18   ;;  %p1343_p13 = scmp.ne.s32.totalorder %s1334_s6, 0 }
 0x319   : > { %s581_s9 = scalar_lea.sflag [#allocation4], %s580_s30 }
 0x31a   : > { %p806_p0 = pnand %p661_p4, %p1343_p13 }
 0x31c   : > { %998 = dma.done.wait (!%p806_p0), %s581_s9, 256  }
 0x31d   : > { %1000 = vsyncadd (!%p806_p0), %s581_s9, 4294967040  ;;  %s1344_s15 = sld [smem:[#allocation12_spill]]  ;;  %p19_p12 = scmp.ge.s32.totalorder %s1085_s24, 4  }
 0x31e   : > { %s1345_s18 = smov %s1007_s19  ;;  %s1346_s19 = smov %s1011_s20 }
 0x31f   : > { %s1348_s21 = smov %s1085_s24  ;;  %21 = sbr.rel (!%p19_p12) target bundleno = 6 (0x6), region = 93 }
 0x323   : > { %s1347_s20 = smov %s1344_s15 }
 0x326   :  { %586 = vsyncpa [#allocation3], 1 }
 0x327   :  { %588 = vsyncpa [#allocation3 + $0x1], 1 }
 0x328   :  { %589 = vsyncpa [#allocation6], 1 }
 0x329   :  { %590 = vsyncpa [#allocation4], 1 }
 0x32a   :  { %592 = vsyncpa [#allocation4 + $0x1], 1 }

</bundles_post_ra>
